<compile_context>
chip_gen: v7x
topology: tpu7x:2x2x1
jax: 0.10.0
libtpu: 0.0.40
codegen_flags: <defaults>
</compile_context>

<pallas_src>
import functools

import jax
import jax.numpy as jnp
from jax import lax
from jax.experimental import pallas as pl
from jax.experimental.pallas import tpu as pltpu


# ---------------------------------------------------------------------------
# Kernel 1: depthwise conv (+bias) -> conv output + per-channel sum / sumsq.
# Block layout (1, Cb, H, W): NCHW direct, W on lanes, H on sublanes.
# Grid: (channel_blocks [parallel], batch [arbitrary, innermost]).
# ---------------------------------------------------------------------------
def _dwconv_stats_kernel(x_ref, w_ref, b_ref, y_ref, ssum_ref, ssq_ref,
                         xpad_ref, *, H, W, K):
    p = K // 2
    n_idx = pl.program_id(1)
    Nb, Cb, Hp, Wp = xpad_ref.shape

    # "same" padding halo: zero ONLY the border strips (interior is fully
    # overwritten below).  VMEM-only and proportional to the border size.
    if p > 0:
        zrow = jnp.zeros((Nb, Cb, p, Wp), jnp.float32)
        zcol = jnp.zeros((Nb, Cb, Hp, p), jnp.float32)
        xpad_ref[:, :, 0:p, :] = zrow
        xpad_ref[:, :, Hp - p:Hp, :] = zrow
        xpad_ref[:, :, :, 0:p] = zcol
        xpad_ref[:, :, :, Wp - p:Wp] = zcol
    xpad_ref[:, :, p:p + H, p:p + W] = x_ref[...].astype(jnp.float32)
    # TODO(synk): the tap slices below start at non-(8,128)-aligned offsets;
    # routing the kh/kw shifts through pltpu.roll (XLU) would avoid masked vld.

    # Depthwise conv: one summed expression over the K*K taps, ONE store.
    w = w_ref[...].astype(jnp.float32)                        # (1, Cb, K, K)
    taps = [xpad_ref[:, :, kh:kh + H, kw:kw + W] * w[:, :, kh:kh + 1, kw:kw + 1]
            for kh in range(K) for kw in range(K)]
    acc = functools.reduce(lambda a, b: a + b, taps)          # (1, Cb, H, W) f32
    acc = acc + b_ref[...]                                    # conv bias
    y_ref[...] = acc.astype(y_ref.dtype)                      # single full-block store

    # Per-channel sum / sum-of-squares carried across the "arbitrary" batch axis.
    @pl.when(n_idx == 0)
    def _init():
        ssum_ref[...] = jnp.zeros_like(ssum_ref)
        ssq_ref[...] = jnp.zeros_like(ssq_ref)

    ssum_ref[...] += jnp.sum(acc, axis=(0, 2, 3), keepdims=True)
    ssq_ref[...] += jnp.sum(acc * acc, axis=(0, 2, 3), keepdims=True)


# ---------------------------------------------------------------------------
# Kernel 2: tiny elementwise BN affine + ReLU sweep over the conv output.
# ---------------------------------------------------------------------------
def _bn_relu_kernel(y_ref, scale_ref, shift_ref, o_ref):
    y = y_ref[...]                                            # f32 block
    o_ref[...] = jnp.maximum(y * scale_ref[...] + shift_ref[...],
                             0.0).astype(o_ref.dtype)


def _vmem_budget_bytes():
    try:
        cap = int(pltpu.get_tpu_info().vmem_capacity_bytes)
    except Exception:
        cap = 64 << 20                     # conservative (v7x-sized) fallback
    # <= ~75% of physical VMEM: ~48 MiB on v7x, ~96 MiB on v5e/v6e.
    return (cap * 3) // 4


def depthwise_conv_bn_relu(x, weight, bias, gamma, beta, *, eps=1e-5):
    """x: (N, C, H, W); weight: (C, 1, K, K); bias/gamma/beta: (C,).

    Matches PyTorch Conv2d(C, C, K, groups=C, padding=K//2) -> BatchNorm2d(C)
    in training mode (batch statistics) -> ReLU.
    """
    N, C, H, W = x.shape
    K = weight.shape[-1]
    assert K % 2 == 1, "same-size depthwise conv assumes odd kernel_size"
    p = K // 2
    Hp, Wp = H + 2 * p, W + 2 * p
    itemsize = jnp.dtype(x.dtype).itemsize

    # Channel-block size: fit the per-generation VMEM budget, aim for >= ~8
    # grid steps, keep >= 2 channel blocks for megacore, never pad channels.
    budget = _vmem_budget_bytes()
    per_chan = (2 * H * W * itemsize       # double-buffered x block
                + 2 * H * W * 4            # double-buffered conv-out block (f32)
                + Hp * Wp * 4)             # padded-input scratch (f32)
    cb_vmem = max(1, (budget - (8 << 20)) // per_chan)
    cb_steps = max(1, C // max(1, -(-8 // N)))    # n_cblk * N >= ~8 when possible
    cb_mega = max(1, C // 2)                      # >= 2 "parallel" channel blocks
    cb_cap = max(1, min(C, cb_vmem, cb_steps, cb_mega))
    Cb = max(d for d in range(1, cb_cap + 1) if C % d == 0)
    n_cblk = C // Cb
    # TODO(synk): for N == 1 with tiny C and very large H*W a single (H, W)
    # block can still exceed the VMEM budget; add an H grid axis with halo
    # exchange (pl.Element offsets / neighbour-row scratch) for that case.

    grid = (n_cblk, N)
    blk_spec = pl.BlockSpec((1, Cb, H, W), lambda c, n: (n, c, 0, 0))
    chan_spec = pl.BlockSpec((1, Cb, 1, 1), lambda c, n: (c, 0, 0, 0))
    w_spec = pl.BlockSpec((1, Cb, K, K), lambda c, n: (c, 0, 0, 0))

    w_blk = weight.reshape(n_cblk, Cb, K, K).astype(jnp.float32)
    b_blk = bias.reshape(n_cblk, Cb, 1, 1).astype(jnp.float32)

    blk_elems = Cb * H * W
    vmem1 = int(min(budget, max(16 << 20,
                                2 * blk_elems * (itemsize + 4)
                                + Cb * Hp * Wp * 4 + (4 << 20))))

    y_conv, ssum, ssq = pl.pallas_call(
        functools.partial(_dwconv_stats_kernel, H=H, W=W, K=K),
        out_shape=(jax.ShapeDtypeStruct((N, C, H, W), jnp.float32),
                   jax.ShapeDtypeStruct((n_cblk, Cb, 1, 1), jnp.float32),
                   jax.ShapeDtypeStruct((n_cblk, Cb, 1, 1), jnp.float32)),
        grid_spec=pltpu.PrefetchScalarGridSpec(
            num_scalar_prefetch=0,
            grid=grid,
            in_specs=[blk_spec, w_spec, chan_spec],
            out_specs=[blk_spec, chan_spec, chan_spec],
            scratch_shapes=[pltpu.VMEM((1, Cb, Hp, Wp), jnp.float32)],
        ),
        compiler_params=pltpu.CompilerParams(
            dimension_semantics=("parallel", "arbitrary"),
            vmem_limit_bytes=vmem1),
    )(x, w_blk, b_blk)

    # Finalize BN scale / shift from the carried sums (C-length math in JAX).
    cnt = float(N * H * W)
    s = ssum.reshape(C)
    ss = ssq.reshape(C)
    mean = s / cnt
    # One-pass (sum, sumsq) biased variance, as PyTorch uses for normalization.
    # NOTE: can lose precision vs a two-pass centred variance for very large
    # N*H*W with a large mean; the clamp only guards against negative values.
    var = jnp.maximum(ss / cnt - mean * mean, 0.0)
    scale = gamma.astype(jnp.float32) * lax.rsqrt(var + eps)
    shift = beta.astype(jnp.float32) - mean * scale
    scale_b = scale.reshape(n_cblk, Cb, 1, 1)
    shift_b = shift.reshape(n_cblk, Cb, 1, 1)

    vmem2 = int(min(budget, max(16 << 20,
                                2 * blk_elems * (4 + itemsize) + (4 << 20))))
    out = pl.pallas_call(
        _bn_relu_kernel,
        out_shape=jax.ShapeDtypeStruct((N, C, H, W), x.dtype),
        grid_spec=pltpu.PrefetchScalarGridSpec(
            num_scalar_prefetch=0,
            grid=grid,
            in_specs=[blk_spec, chan_spec, chan_spec],
            out_specs=blk_spec,
        ),
        compiler_params=pltpu.CompilerParams(
            dimension_semantics=("parallel", "parallel"),
            vmem_limit_bytes=vmem2),
    )(y_conv, scale_b, shift_b)
    return out


def _reference(x, weight, bias, gamma, beta, eps=1e-5):
    """Plain-JAX reference matching PyTorch DepthwiseConv.forward (train mode)."""
    C = x.shape[1]
    K = weight.shape[-1]
    p = K // 2
    out = lax.conv_general_dilated(
        x, weight, window_strides=(1, 1), padding=((p, p), (p, p)),
        dimension_numbers=("NCHW", "OIHW", "NCHW"),
        feature_group_count=C)
    out = out + bias[None, :, None, None]
    mean = out.mean(axis=(0, 2, 3), keepdims=True)
    var = ((out - mean) ** 2).mean(axis=(0, 2, 3), keepdims=True)
    xhat = (out - mean) * lax.rsqrt(var + eps)
    y = gamma[None, :, None, None] * xhat + beta[None, :, None, None]
    return jnp.maximum(y, 0.0)


if __name__ == "__main__":
    N, C, H, W = 2, 4, 16, 16
    K = 3

    key = jax.random.PRNGKey(0)
    kx, kw, kb, kg, kbt = jax.random.split(key, 5)

    x = jax.random.normal(kx, (N, C, H, W), dtype=jnp.float32)
    weight = jax.random.normal(kw, (C, 1, K, K), dtype=jnp.float32) * 0.1
    bias = jax.random.normal(kb, (C,), dtype=jnp.float32) * 0.1
    gamma = 1.0 + 0.1 * jax.random.normal(kg, (C,), dtype=jnp.float32)
    beta = 0.1 * jax.random.normal(kbt, (C,), dtype=jnp.float32)

    fwd = jax.jit(depthwise_conv_bn_relu)
    out = jax.block_until_ready(fwd(x, weight, bias, gamma, beta))
    ref = _reference(x, weight, bias, gamma, beta)

    assert out.shape == (N, C, H, W)
    err = float(jnp.max(jnp.abs(out - ref)))
    assert jnp.allclose(out, ref, rtol=1e-4, atol=1e-4), f"max abs err = {err}"

    print("KERNEL_OK")
</pallas_src>

<mosaic_0001>
module attributes {stable_mosaic.version = 11 : i64} {
  func.func @_dwconv_stats_kernel(%arg0: i32, %arg1: i32, %arg2: memref<1x1x16x16xf32, #tpu.memory_space<vmem>>, %arg3: memref<1x1x3x3xf32, #tpu.memory_space<vmem>>, %arg4: memref<1x1x1x1xf32, #tpu.memory_space<vmem>>, %arg5: memref<1x1x16x16xf32, #tpu.memory_space<vmem>>, %arg6: memref<1x1x1x1xf32, #tpu.memory_space<vmem>>, %arg7: memref<1x1x1x1xf32, #tpu.memory_space<vmem>>, %arg8: memref<1x1x18x18xf32, #tpu.memory_space<vmem>>) attributes {dimension_semantics = [#tpu.dimension_semantics<parallel>, #tpu.dimension_semantics<arbitrary>], iteration_bounds = array<i64: 4, 2>, scalar_prefetch = 0 : i64, scratch_operands = 1 : i64, tpu.core_type = #tpu.core_type<tc>, window_params = [{transform_indices = @transform_0, window_bounds = array<i64: 1, 1, 16, 16>}, {transform_indices = @transform_1, window_bounds = array<i64: 1, 1, 3, 3>}, {transform_indices = @transform_2, window_bounds = array<i64: 1, 1, 1, 1>}, {transform_indices = @transform_3, window_bounds = array<i64: 1, 1, 16, 16>}, {transform_indices = @transform_4, window_bounds = array<i64: 1, 1, 1, 1>}, {transform_indices = @transform_5, window_bounds = array<i64: 1, 1, 1, 1>}]} {
    %cst = arith.constant 0.000000e+00 : f32
    %0 = vector.broadcast %cst : f32 to vector<1x1x1x18xf32>
    %cst_0 = arith.constant 0.000000e+00 : f32
    %1 = vector.broadcast %cst_0 : f32 to vector<1x1x18x1xf32>
    %c0 = arith.constant 0 : index
    %c0_1 = arith.constant 0 : index
    %c0_2 = arith.constant 0 : index
    %c0_3 = arith.constant 0 : index
    %2 = vector.load %arg8[%c0, %c0_1, %c0_2, %c0_3] : memref<1x1x18x18xf32, #tpu.memory_space<vmem>>, vector<1x1x1x18xf32>
    tpu.vector_store %arg8[%c0, %c0_1, %c0_2, %c0_3], %0 {strides = array<i32>} : memref<1x1x18x18xf32, #tpu.memory_space<vmem>>, vector<1x1x1x18xf32>,
    %c0_4 = arith.constant 0 : index
    %c0_5 = arith.constant 0 : index
    %c17 = arith.constant 17 : index
    %c0_6 = arith.constant 0 : index
    %3 = vector.load %arg8[%c0_4, %c0_5, %c17, %c0_6] : memref<1x1x18x18xf32, #tpu.memory_space<vmem>>, vector<1x1x1x18xf32>
    tpu.vector_store %arg8[%c0_4, %c0_5, %c17, %c0_6], %0 {strides = array<i32>} : memref<1x1x18x18xf32, #tpu.memory_space<vmem>>, vector<1x1x1x18xf32>,
    %c0_7 = arith.constant 0 : index
    %c0_8 = arith.constant 0 : index
    %c0_9 = arith.constant 0 : index
    %c0_10 = arith.constant 0 : index
    %4 = vector.load %arg8[%c0_7, %c0_8, %c0_9, %c0_10] : memref<1x1x18x18xf32, #tpu.memory_space<vmem>>, vector<1x1x18x1xf32>
    tpu.vector_store %arg8[%c0_7, %c0_8, %c0_9, %c0_10], %1 {strides = array<i32>} : memref<1x1x18x18xf32, #tpu.memory_space<vmem>>, vector<1x1x18x1xf32>,
    %c0_11 = arith.constant 0 : index
    %c0_12 = arith.constant 0 : index
    %c0_13 = arith.constant 0 : index
    %c17_14 = arith.constant 17 : index
    %5 = vector.load %arg8[%c0_11, %c0_12, %c0_13, %c17_14] : memref<1x1x18x18xf32, #tpu.memory_space<vmem>>, vector<1x1x18x1xf32>
    tpu.vector_store %arg8[%c0_11, %c0_12, %c0_13, %c17_14], %1 {strides = array<i32>} : memref<1x1x18x18xf32, #tpu.memory_space<vmem>>, vector<1x1x18x1xf32>,
    %c0_15 = arith.constant 0 : index
    %c0_16 = arith.constant 0 : index
    %c0_17 = arith.constant 0 : index
    %c0_18 = arith.constant 0 : index
    %6 = vector.load %arg2[%c0_15, %c0_16, %c0_17, %c0_18] : memref<1x1x16x16xf32, #tpu.memory_space<vmem>>, vector<1x1x16x16xf32>
    %c0_19 = arith.constant 0 : index
    %c0_20 = arith.constant 0 : index
    %c1 = arith.constant 1 : index
    %c1_21 = arith.constant 1 : index
    %7 = vector.load %arg8[%c0_19, %c0_20, %c1, %c1_21] : memref<1x1x18x18xf32, #tpu.memory_space<vmem>>, vector<1x1x16x16xf32>
    tpu.vector_store %arg8[%c0_19, %c0_20, %c1, %c1_21], %6 {strides = array<i32>} : memref<1x1x18x18xf32, #tpu.memory_space<vmem>>, vector<1x1x16x16xf32>,
    %c0_22 = arith.constant 0 : index
    %c0_23 = arith.constant 0 : index
    %c0_24 = arith.constant 0 : index
    %c0_25 = arith.constant 0 : index
    %8 = vector.load %arg3[%c0_22, %c0_23, %c0_24, %c0_25] : memref<1x1x3x3xf32, #tpu.memory_space<vmem>>, vector<1x1x3x3xf32>
    %c0_26 = arith.constant 0 : index
    %c0_27 = arith.constant 0 : index
    %c0_28 = arith.constant 0 : index
    %c0_29 = arith.constant 0 : index
    %9 = vector.load %arg8[%c0_26, %c0_27, %c0_28, %c0_29] : memref<1x1x18x18xf32, #tpu.memory_space<vmem>>, vector<1x1x16x16xf32>
    %10 = vector.extract_strided_slice %8 {offsets = [0, 0, 0, 0], sizes = [1, 1, 1, 1], strides = [1, 1, 1, 1]} : vector<1x1x3x3xf32> to vector<1x1x1x1xf32>
    %11 = vector.broadcast %10 : vector<1x1x1x1xf32> to vector<1x1x16x16xf32>
    %12 = arith.mulf %9, %11 : vector<1x1x16x16xf32>
    %c0_30 = arith.constant 0 : index
    %c0_31 = arith.constant 0 : index
    %c0_32 = arith.constant 0 : index
    %c1_33 = arith.constant 1 : index
    %13 = vector.load %arg8[%c0_30, %c0_31, %c0_32, %c1_33] : memref<1x1x18x18xf32, #tpu.memory_space<vmem>>, vector<1x1x16x16xf32>
    %14 = vector.extract_strided_slice %8 {offsets = [0, 0, 0, 1], sizes = [1, 1, 1, 1], strides = [1, 1, 1, 1]} : vector<1x1x3x3xf32> to vector<1x1x1x1xf32>
    %15 = vector.broadcast %14 : vector<1x1x1x1xf32> to vector<1x1x16x16xf32>
    %16 = arith.mulf %13, %15 : vector<1x1x16x16xf32>
    %c0_34 = arith.constant 0 : index
    %c0_35 = arith.constant 0 : index
    %c0_36 = arith.constant 0 : index
    %c2 = arith.constant 2 : index
    %17 = vector.load %arg8[%c0_34, %c0_35, %c0_36, %c2] : memref<1x1x18x18xf32, #tpu.memory_space<vmem>>, vector<1x1x16x16xf32>
    %18 = vector.extract_strided_slice %8 {offsets = [0, 0, 0, 2], sizes = [1, 1, 1, 1], strides = [1, 1, 1, 1]} : vector<1x1x3x3xf32> to vector<1x1x1x1xf32>
    %19 = vector.broadcast %18 : vector<1x1x1x1xf32> to vector<1x1x16x16xf32>
    %20 = arith.mulf %17, %19 : vector<1x1x16x16xf32>
    %c0_37 = arith.constant 0 : index
    %c0_38 = arith.constant 0 : index
    %c1_39 = arith.constant 1 : index
    %c0_40 = arith.constant 0 : index
    %21 = vector.load %arg8[%c0_37, %c0_38, %c1_39, %c0_40] : memref<1x1x18x18xf32, #tpu.memory_space<vmem>>, vector<1x1x16x16xf32>
    %22 = vector.extract_strided_slice %8 {offsets = [0, 0, 1, 0], sizes = [1, 1, 1, 1], strides = [1, 1, 1, 1]} : vector<1x1x3x3xf32> to vector<1x1x1x1xf32>
    %23 = vector.broadcast %22 : vector<1x1x1x1xf32> to vector<1x1x16x16xf32>
    %24 = arith.mulf %21, %23 : vector<1x1x16x16xf32>
    %c0_41 = arith.constant 0 : index
    %c0_42 = arith.constant 0 : index
    %c1_43 = arith.constant 1 : index
    %c1_44 = arith.constant 1 : index
    %25 = vector.load %arg8[%c0_41, %c0_42, %c1_43, %c1_44] : memref<1x1x18x18xf32, #tpu.memory_space<vmem>>, vector<1x1x16x16xf32>
    %26 = vector.extract_strided_slice %8 {offsets = [0, 0, 1, 1], sizes = [1, 1, 1, 1], strides = [1, 1, 1, 1]} : vector<1x1x3x3xf32> to vector<1x1x1x1xf32>
    %27 = vector.broadcast %26 : vector<1x1x1x1xf32> to vector<1x1x16x16xf32>
    %28 = arith.mulf %25, %27 : vector<1x1x16x16xf32>
    %c0_45 = arith.constant 0 : index
    %c0_46 = arith.constant 0 : index
    %c1_47 = arith.constant 1 : index
    %c2_48 = arith.constant 2 : index
    %29 = vector.load %arg8[%c0_45, %c0_46, %c1_47, %c2_48] : memref<1x1x18x18xf32, #tpu.memory_space<vmem>>, vector<1x1x16x16xf32>
    %30 = vector.extract_strided_slice %8 {offsets = [0, 0, 1, 2], sizes = [1, 1, 1, 1], strides = [1, 1, 1, 1]} : vector<1x1x3x3xf32> to vector<1x1x1x1xf32>
    %31 = vector.broadcast %30 : vector<1x1x1x1xf32> to vector<1x1x16x16xf32>
    %32 = arith.mulf %29, %31 : vector<1x1x16x16xf32>
    %c0_49 = arith.constant 0 : index
    %c0_50 = arith.constant 0 : index
    %c2_51 = arith.constant 2 : index
    %c0_52 = arith.constant 0 : index
    %33 = vector.load %arg8[%c0_49, %c0_50, %c2_51, %c0_52] : memref<1x1x18x18xf32, #tpu.memory_space<vmem>>, vector<1x1x16x16xf32>
    %34 = vector.extract_strided_slice %8 {offsets = [0, 0, 2, 0], sizes = [1, 1, 1, 1], strides = [1, 1, 1, 1]} : vector<1x1x3x3xf32> to vector<1x1x1x1xf32>
    %35 = vector.broadcast %34 : vector<1x1x1x1xf32> to vector<1x1x16x16xf32>
    %36 = arith.mulf %33, %35 : vector<1x1x16x16xf32>
    %c0_53 = arith.constant 0 : index
    %c0_54 = arith.constant 0 : index
    %c2_55 = arith.constant 2 : index
    %c1_56 = arith.constant 1 : index
    %37 = vector.load %arg8[%c0_53, %c0_54, %c2_55, %c1_56] : memref<1x1x18x18xf32, #tpu.memory_space<vmem>>, vector<1x1x16x16xf32>
    %38 = vector.extract_strided_slice %8 {offsets = [0, 0, 2, 1], sizes = [1, 1, 1, 1], strides = [1, 1, 1, 1]} : vector<1x1x3x3xf32> to vector<1x1x1x1xf32>
    %39 = vector.broadcast %38 : vector<1x1x1x1xf32> to vector<1x1x16x16xf32>
    %40 = arith.mulf %37, %39 : vector<1x1x16x16xf32>
    %c0_57 = arith.constant 0 : index
    %c0_58 = arith.constant 0 : index
    %c2_59 = arith.constant 2 : index
    %c2_60 = arith.constant 2 : index
    %41 = vector.load %arg8[%c0_57, %c0_58, %c2_59, %c2_60] : memref<1x1x18x18xf32, #tpu.memory_space<vmem>>, vector<1x1x16x16xf32>
    %42 = vector.extract_strided_slice %8 {offsets = [0, 0, 2, 2], sizes = [1, 1, 1, 1], strides = [1, 1, 1, 1]} : vector<1x1x3x3xf32> to vector<1x1x1x1xf32>
    %43 = vector.broadcast %42 : vector<1x1x1x1xf32> to vector<1x1x16x16xf32>
    %44 = arith.mulf %41, %43 : vector<1x1x16x16xf32>
    %45 = arith.addf %12, %16 : vector<1x1x16x16xf32>
    %46 = arith.addf %45, %20 : vector<1x1x16x16xf32>
    %47 = arith.addf %46, %24 : vector<1x1x16x16xf32>
    %48 = arith.addf %47, %28 : vector<1x1x16x16xf32>
    %49 = arith.addf %48, %32 : vector<1x1x16x16xf32>
    %50 = arith.addf %49, %36 : vector<1x1x16x16xf32>
    %51 = arith.addf %50, %40 : vector<1x1x16x16xf32>
    %52 = arith.addf %51, %44 : vector<1x1x16x16xf32>
    %c0_61 = arith.constant 0 : index
    %c0_62 = arith.constant 0 : index
    %c0_63 = arith.constant 0 : index
    %c0_64 = arith.constant 0 : index
    %53 = vector.load %arg4[%c0_61, %c0_62, %c0_63, %c0_64] : memref<1x1x1x1xf32, #tpu.memory_space<vmem>>, vector<1x1x1x1xf32>
    %54 = vector.broadcast %53 : vector<1x1x1x1xf32> to vector<1x1x16x16xf32>
    %55 = arith.addf %52, %54 : vector<1x1x16x16xf32>
    %c0_65 = arith.constant 0 : index
    %c0_66 = arith.constant 0 : index
    %c0_67 = arith.constant 0 : index
    %c0_68 = arith.constant 0 : index
    %56 = vector.load %arg5[%c0_65, %c0_66, %c0_67, %c0_68] : memref<1x1x16x16xf32, #tpu.memory_space<vmem>>, vector<1x1x16x16xf32>
    tpu.vector_store %arg5[%c0_65, %c0_66, %c0_67, %c0_68], %55 {strides = array<i32>} : memref<1x1x16x16xf32, #tpu.memory_space<vmem>>, vector<1x1x16x16xf32>,
    %c0_i32 = arith.constant 0 : i32
    %57 = arith.cmpi eq, %arg1, %c0_i32 : i32
    %58 = arith.extui %57 : i1 to i32
    %c0_i32_69 = arith.constant 0 : i32
    %59 = arith.cmpi ne, %58, %c0_i32_69 : i32
    scf.if %59 {
      %cst_88 = arith.constant 0.000000e+00 : f32
      %71 = vector.broadcast %cst_88 : f32 to vector<1x1x1x1xf32>
      %c0_89 = arith.constant 0 : index
      %c0_90 = arith.constant 0 : index
      %c0_91 = arith.constant 0 : index
      %c0_92 = arith.constant 0 : index
      %72 = vector.load %arg6[%c0_89, %c0_90, %c0_91, %c0_92] : memref<1x1x1x1xf32, #tpu.memory_space<vmem>>, vector<1x1x1x1xf32>
      tpu.vector_store %arg6[%c0_89, %c0_90, %c0_91, %c0_92], %71 {strides = array<i32>} : memref<1x1x1x1xf32, #tpu.memory_space<vmem>>, vector<1x1x1x1xf32>,
      %cst_93 = arith.constant 0.000000e+00 : f32
      %73 = vector.broadcast %cst_93 : f32 to vector<1x1x1x1xf32>
      %c0_94 = arith.constant 0 : index
      %c0_95 = arith.constant 0 : index
      %c0_96 = arith.constant 0 : index
      %c0_97 = arith.constant 0 : index
      %74 = vector.load %arg7[%c0_94, %c0_95, %c0_96, %c0_97] : memref<1x1x1x1xf32, #tpu.memory_space<vmem>>, vector<1x1x1x1xf32>
      tpu.vector_store %arg7[%c0_94, %c0_95, %c0_96, %c0_97], %73 {strides = array<i32>} : memref<1x1x1x1xf32, #tpu.memory_space<vmem>>, vector<1x1x1x1xf32>,
    } else {
    }
    %c0_70 = arith.constant 0 : index
    %c0_71 = arith.constant 0 : index
    %c0_72 = arith.constant 0 : index
    %c0_73 = arith.constant 0 : index
    %60 = vector.load %arg6[%c0_70, %c0_71, %c0_72, %c0_73] : memref<1x1x1x1xf32, #tpu.memory_space<vmem>>, vector<1x1x1x1xf32>
    %cst_74 = arith.constant dense<0.000000e+00> : vector<1xf32>
    %61 = vector.multi_reduction <add>, %55, %cst_74 [0, 2, 3] : vector<1x1x16x16xf32> to vector<1xf32>
    %62 = vector.shape_cast %61 : vector<1xf32> to vector<1x1x1x1xf32>
    %63 = arith.addf %60, %62 : vector<1x1x1x1xf32>
    %c0_75 = arith.constant 0 : index
    %c0_76 = arith.constant 0 : index
    %c0_77 = arith.constant 0 : index
    %c0_78 = arith.constant 0 : index
    %64 = vector.load %arg6[%c0_75, %c0_76, %c0_77, %c0_78] : memref<1x1x1x1xf32, #tpu.memory_space<vmem>>, vector<1x1x1x1xf32>
    tpu.vector_store %arg6[%c0_75, %c0_76, %c0_77, %c0_78], %63 {strides = array<i32>} : memref<1x1x1x1xf32, #tpu.memory_space<vmem>>, vector<1x1x1x1xf32>,
    %c0_79 = arith.constant 0 : index
    %c0_80 = arith.constant 0 : index
    %c0_81 = arith.constant 0 : index
    %c0_82 = arith.constant 0 : index
    %65 = vector.load %arg7[%c0_79, %c0_80, %c0_81, %c0_82] : memref<1x1x1x1xf32, #tpu.memory_space<vmem>>, vector<1x1x1x1xf32>
    %66 = arith.mulf %55, %55 : vector<1x1x16x16xf32>
    %cst_83 = arith.constant dense<0.000000e+00> : vector<1xf32>
    %67 = vector.multi_reduction <add>, %66, %cst_83 [0, 2, 3] : vector<1x1x16x16xf32> to vector<1xf32>
    %68 = vector.shape_cast %67 : vector<1xf32> to vector<1x1x1x1xf32>
    %69 = arith.addf %65, %68 : vector<1x1x1x1xf32>
    %c0_84 = arith.constant 0 : index
    %c0_85 = arith.constant 0 : index
    %c0_86 = arith.constant 0 : index
    %c0_87 = arith.constant 0 : index
    %70 = vector.load %arg7[%c0_84, %c0_85, %c0_86, %c0_87] : memref<1x1x1x1xf32, #tpu.memory_space<vmem>>, vector<1x1x1x1xf32>
    tpu.vector_store %arg7[%c0_84, %c0_85, %c0_86, %c0_87], %69 {strides = array<i32>} : memref<1x1x1x1xf32, #tpu.memory_space<vmem>>, vector<1x1x1x1xf32>,
    return
  }
  func.func @transform_0(%arg0: i32, %arg1: i32) -> (i32, i32, i32, i32) {
    %c0_i32 = arith.constant 0 : i32
    %c0_i32_0 = arith.constant 0 : i32
    %c0_i32_1 = arith.constant 0 : i32
    return %arg1, %arg0, %c0_i32, %c0_i32_0 : i32, i32, i32, i32
  }
  func.func @transform_1(%arg0: i32, %arg1: i32) -> (i32, i32, i32, i32) {
    %c0_i32 = arith.constant 0 : i32
    %c0_i32_0 = arith.constant 0 : i32
    %c0_i32_1 = arith.constant 0 : i32
    %c0_i32_2 = arith.constant 0 : i32
    return %arg0, %c0_i32, %c0_i32_0, %c0_i32_1 : i32, i32, i32, i32
  }
  func.func @transform_2(%arg0: i32, %arg1: i32) -> (i32, i32, i32, i32) {
    %c0_i32 = arith.constant 0 : i32
    %c0_i32_0 = arith.constant 0 : i32
    %c0_i32_1 = arith.constant 0 : i32
    %c0_i32_2 = arith.constant 0 : i32
    return %arg0, %c0_i32, %c0_i32_0, %c0_i32_1 : i32, i32, i32, i32
  }
  func.func @transform_3(%arg0: i32, %arg1: i32) -> (i32, i32, i32, i32) {
    %c0_i32 = arith.constant 0 : i32
    %c0_i32_0 = arith.constant 0 : i32
    %c0_i32_1 = arith.constant 0 : i32
    return %arg1, %arg0, %c0_i32, %c0_i32_0 : i32, i32, i32, i32
  }
  func.func @transform_4(%arg0: i32, %arg1: i32) -> (i32, i32, i32, i32) {
    %c0_i32 = arith.constant 0 : i32
    %c0_i32_0 = arith.constant 0 : i32
    %c0_i32_1 = arith.constant 0 : i32
    %c0_i32_2 = arith.constant 0 : i32
    return %arg0, %c0_i32, %c0_i32_0, %c0_i32_1 : i32, i32, i32, i32
  }
  func.func @transform_5(%arg0: i32, %arg1: i32) -> (i32, i32, i32, i32) {
    %c0_i32 = arith.constant 0 : i32
    %c0_i32_0 = arith.constant 0 : i32
    %c0_i32_1 = arith.constant 0 : i32
    %c0_i32_2 = arith.constant 0 : i32
    return %arg0, %c0_i32, %c0_i32_0, %c0_i32_1 : i32, i32, i32, i32
  }
}

module attributes {stable_mosaic.version = 11 : i64} {
  func.func @_bn_relu_kernel(%arg0: i32, %arg1: i32, %arg2: memref<1x1x16x16xf32, #tpu.memory_space<vmem>>, %arg3: memref<1x1x1x1xf32, #tpu.memory_space<vmem>>, %arg4: memref<1x1x1x1xf32, #tpu.memory_space<vmem>>, %arg5: memref<1x1x16x16xf32, #tpu.memory_space<vmem>>) attributes {dimension_semantics = [#tpu.dimension_semantics<parallel>, #tpu.dimension_semantics<parallel>], iteration_bounds = array<i64: 4, 2>, scalar_prefetch = 0 : i64, scratch_operands = 0 : i64, tpu.core_type = #tpu.core_type<tc>, window_params = [{transform_indices = @transform_0, window_bounds = array<i64: 1, 1, 16, 16>}, {transform_indices = @transform_1, window_bounds = array<i64: 1, 1, 1, 1>}, {transform_indices = @transform_2, window_bounds = array<i64: 1, 1, 1, 1>}, {transform_indices = @transform_3, window_bounds = array<i64: 1, 1, 16, 16>}]} {
    %c0 = arith.constant 0 : index
    %c0_0 = arith.constant 0 : index
    %c0_1 = arith.constant 0 : index
    %c0_2 = arith.constant 0 : index
    %0 = vector.load %arg2[%c0, %c0_0, %c0_1, %c0_2] : memref<1x1x16x16xf32, #tpu.memory_space<vmem>>, vector<1x1x16x16xf32>
    %c0_3 = arith.constant 0 : index
    %c0_4 = arith.constant 0 : index
    %c0_5 = arith.constant 0 : index
    %c0_6 = arith.constant 0 : index
    %1 = vector.load %arg3[%c0_3, %c0_4, %c0_5, %c0_6] : memref<1x1x1x1xf32, #tpu.memory_space<vmem>>, vector<1x1x1x1xf32>
    %2 = vector.broadcast %1 : vector<1x1x1x1xf32> to vector<1x1x16x16xf32>
    %3 = arith.mulf %0, %2 : vector<1x1x16x16xf32>
    %c0_7 = arith.constant 0 : index
    %c0_8 = arith.constant 0 : index
    %c0_9 = arith.constant 0 : index
    %c0_10 = arith.constant 0 : index
    %4 = vector.load %arg4[%c0_7, %c0_8, %c0_9, %c0_10] : memref<1x1x1x1xf32, #tpu.memory_space<vmem>>, vector<1x1x1x1xf32>
    %5 = vector.broadcast %4 : vector<1x1x1x1xf32> to vector<1x1x16x16xf32>
    %6 = arith.addf %3, %5 : vector<1x1x16x16xf32>
    %cst = arith.constant 0.000000e+00 : f32
    %7 = vector.broadcast %cst : f32 to vector<1x1x16x16xf32>
    %8 = arith.maximumf %6, %7 : vector<1x1x16x16xf32>
    %c0_11 = arith.constant 0 : index
    %c0_12 = arith.constant 0 : index
    %c0_13 = arith.constant 0 : index
    %c0_14 = arith.constant 0 : index
    %9 = vector.load %arg5[%c0_11, %c0_12, %c0_13, %c0_14] : memref<1x1x16x16xf32, #tpu.memory_space<vmem>>, vector<1x1x16x16xf32>
    tpu.vector_store %arg5[%c0_11, %c0_12, %c0_13, %c0_14], %8 {strides = array<i32>} : memref<1x1x16x16xf32, #tpu.memory_space<vmem>>, vector<1x1x16x16xf32>,
    return
  }
  func.func @transform_0(%arg0: i32, %arg1: i32) -> (i32, i32, i32, i32) {
    %c0_i32 = arith.constant 0 : i32
    %c0_i32_0 = arith.constant 0 : i32
    %c0_i32_1 = arith.constant 0 : i32
    return %arg1, %arg0, %c0_i32, %c0_i32_0 : i32, i32, i32, i32
  }
  func.func @transform_1(%arg0: i32, %arg1: i32) -> (i32, i32, i32, i32) {
    %c0_i32 = arith.constant 0 : i32
    %c0_i32_0 = arith.constant 0 : i32
    %c0_i32_1 = arith.constant 0 : i32
    %c0_i32_2 = arith.constant 0 : i32
    return %arg0, %c0_i32, %c0_i32_0, %c0_i32_1 : i32, i32, i32, i32
  }
  func.func @transform_2(%arg0: i32, %arg1: i32) -> (i32, i32, i32, i32) {
    %c0_i32 = arith.constant 0 : i32
    %c0_i32_0 = arith.constant 0 : i32
    %c0_i32_1 = arith.constant 0 : i32
    %c0_i32_2 = arith.constant 0 : i32
    return %arg0, %c0_i32, %c0_i32_0, %c0_i32_1 : i32, i32, i32, i32
  }
  func.func @transform_3(%arg0: i32, %arg1: i32) -> (i32, i32, i32, i32) {
    %c0_i32 = arith.constant 0 : i32
    %c0_i32_0 = arith.constant 0 : i32
    %c0_i32_1 = arith.constant 0 : i32
    return %arg1, %arg0, %c0_i32, %c0_i32_0 : i32, i32, i32, i32
  }
}

</mosaic_0001>

<bundles_post_ra>
// kernel: depthwise_conv_bn_relu.3
= control target key start
LH: loop header
LB: loop body
LE: loop exit
PB: predicated region body
PF: predicated region fallthrough
CT: control target
= control target key end

     0   :  { %s733_s0 = inlined_call_operand.vmem [shape: f32[2,4,16,16], index: 0, kind: input, shape index: {}]   ;;  %s734_s1 = inlined_call_operand.vmem [shape: f32[4,1,1,1], index: 1, kind: input, shape index: {}]   ;;  %s735_s2 = inlined_call_operand.vmem [shape: f32[4,1,1,1], index: 2, kind: input, shape index: {}]   ;;  %s736_s3 = inlined_call_operand.hbm [shape: f32[2,4,16,16], index: 3, kind: output, shape index: {}]  }
   0x1   :  { %738 = sst [smem:[#allocation6_spill]] %s734_s1 }
   0x2   :  { %8 = vsyncpa [#allocation3], 0 }
   0x3   :  { %10 = vsyncpa [#allocation3 + $0x1], 0  ;;  %s587_s12 = smov 0   ;;  %s589_s13 = smov 0  }
   0x4   :  { %s591_s14 = smov 0   ;;  %s593_s15 = smov 0  }
   0x5   :  { %s595_s16 = smov 0   ;;  %s597_s17 = smov 0  }
   0x6   :  { %s599_s18 = smov 0   ;;  %s601_s19 = smov 0  }
   0x7 LB: > { %s375_s20 = sadd.s32 4294967295, %s561_s19   ;;  %s376_s21 = sadd.s32 4294967294, %s561_s19   ;;  %s561_s19 = sphi %s601_s19, %s16_s19   ;;  %s557_s18 = sphi %s599_s18, %s750_s18   ;;  %s553_s17 = sphi %s597_s17, %s749_s17   ;;  %s549_s16 = sphi %s595_s16, %s748_s16   ;;  %s545_s15 = sphi %s593_s15, %s747_s15   ;;  %s541_s14 = sphi %s591_s14, %s746_s14   ;;  %s537_s13 = sphi %s589_s13, %s745_s13   ;;  %s533_s12 = sphi %s587_s12, %s744_s12  }
   0x8   : > { %s25_s22 = sadd.s32 1, %s553_s17  ;;  %s28_s23 = sadd.s32 1, %s557_s18 }
   0x9   : > { %p26_p0 = scmp.ge.s32.totalorder %s25_s22, 2  ;;  %p127_p1 = scmp.ne.s32.totalorder %s541_s14, %s537_s13 }
   0xa   : > { %p128_p2 = scmp.eq.s32.totalorder %s375_s20, 7  ;;  %p133_p5 = scmp.ne.s32.totalorder %s537_s13, %s533_s12 }
   0xb   : > { %s752_s22 = smov (%p26_p0, %s25_s22), 0  ;;  %s754_s23 = smov (!%p26_p0, %s28_s23), %s557_s18 }
   0xc   : > { %s112_s24 = ssub.s32 %s553_s17, %s752_s22  ;;  %p638_p3 = por %p128_p2, %p127_p1 }
   0xd   : > { %p30_p4 = scmp.ge.s32.totalorder %s754_s23, 4  ;;  %p134_p6 = scmp.eq.s32.totalorder %s376_s21, 7 }
   0xe   : > { %p379_p7 = scmp.ge.s32.totalorder %s561_s19, 1  ;;  %p176_p9 = scmp.lt.s32.totalorder %s561_s19, 9 }
   0xf   : > { %s756_s23 = smov (%p30_p4, %s754_s23), 0  ;;  %p647_p8 = por %p134_p6, %p133_p5 }
  0x10   : > { %740 = sst [smem:[#allocation5_spill]] %s756_s23  ;;  %s113_s27 = ssub.s32 %s557_s18, %s756_s23 }
  0x11   : > { %s117_s28 = sadd.s32 1, %s541_s14  ;;  %s114_s29 = sor.u32 %s113_s27, %s112_s24 }
  0x12   : > { %p177_p10 = pnand %p379_p7, %p176_p9  ;;  %p115_p11 = scmp.eq.s32.totalorder %s114_s29, 0 }
  0x13   : > { %p212_p12 = scmp.lt.s32.totalorder (!%p177_p10), %s549_s16, 3  ;;  %v563_v0 = vmov (!%p177_p10), 0   ;;  %s742_s1 = sld [smem:[#allocation6_spill]] (!%p177_p10)  ;;  %vm253_vm0 = vcmask (!%p177_p10), 130048  }
  0x14   : > { %s656_s30 = scalar_select %p115_p11, %s541_s14, %s117_s28  }
  0x15   : > { %180 = sbr.rel (%p177_p10) target bundleno = 183 (0xb7), region = 32  ;;  %466 = vset.pattern.permute.xlu0 (!%p177_p10), %v563_v0  ;;  %p210_p13 = scmp.lt.s32.totalorder (!%p177_p10), %s545_s15, 1 }
  0x16   : > { %s207_s28 = sand.u32 (!%p177_p10), 1, %s537_s13   ;;  %s387_s23 = sshll.u32 (!%p177_p10), %s549_s16, 1 }
  0x17   : > { %s388_s8 = sshll.u32 (!%p177_p10), %s545_s15, 3 }
  0x1c   : > { %s213_s4 = scalar_select %p212_p12, %s549_s16, 3 }
  0x1d   : > { %s211_s11 = scalar_select %p210_p13, %s545_s15, 1 }
  0x1e   : > { %s221_s7 = scalar_lea.vmem %s742_s1, %s213_s4  ;;  %s224_s10 = scalar_lea.vmem %s735_s2, %s213_s4 }
  0x1f   : > { %v384_v1 = vld [vmem:[%s221_s7] ss:$0 sm:$0xff]  ;;  %s381_s20 = sshll.u32 %s213_s4, 1  ;;  %s382_s21 = sshll.u32 %s211_s11, 3 }
  0x20   : > { %234 = vperm.xlu0 %466, %v384_v1   ;;  %v385_v2 = vld [vmem:[%s224_s10] ss:$0 sm:$0xff]  ;;  %s216_s24 = sadd.s32 %s382_s21, %s381_s20  ;;  %s380_s1 = sshll.u32 %s207_s28, 4 }
  0x21   : > { %s383_s27 = sshll.u32 %s216_s24, 3  ;;  %s269_s7 = sadd.s32 %s388_s8, %s387_s23 }
  0x22   : > { %s218_s6 = scalar_lea.vmem %s733_s0, %s383_s27  ;;  %s209_s9 = scalar_lea.vmem [#allocation2], %s380_s1 }
  0x23   : > { %v225_v4 = vld [vmem:[%s218_s6] sm:$0xff]  ;;  %v226_v5 = vld [vmem:[%s218_s6 + $0x8] sm:$0xff]  ;;  %s272_s4 = sshll.u32 %s209_s9, 4  ;;  %s389_s10 = sshll.u32 %s269_s7, 7  ;;  %s674_s4 = int_to_ptr.vmem [resolvable:$true] %s272_s4 }
  0x24   : > { %246 = vperm.xlu0 %466, %v385_v2   ;;  %s679_s23 = scalar_lea.hbm %s736_s3, %s389_s10  ;;  %s681_s1 = scalar_lea.sflag [#allocation3], %s207_s28 }
  0x25   : > { %s467_s11 = scalar_lea.vmem %s674_s4, 256  ;;  %s564_s20 = smov [#allocation2]  }
  0x26   : > { %p468_p0 = scmp.ne.s32.totalorder %s674_s4, %s467_s11  ;;  %s471_s21 = sshll.u32 %s564_s20, 4  ;;  %s472_s21 = int_to_ptr.vmem [resolvable:$false] %s471_s21 }
  0x27   : > { %s473_s24 = scalar_lea.vmem %s472_s21, 512  ;;  %p474_p4 = scmp.lt.s32.totalorder %s674_s4, %s472_s21 }
  0x28   : > { %p469_p1 = pnand %p468_p0, %p638_p3  ;;  %p475_p5 = scmp.lt.s32.totalorder %s473_s24, %s467_s11 }
  0x2a   : > { %p470_p2 = pneg %p469_p1  ;;  %p476_p6 = por %p475_p5, %p474_p4 }
  0x2c   : > { %p477_p7 = pnand %p476_p6, %p470_p2 }
  0x9f   : > { %v235_v3 = vpop.permute.xlu0 %234 }
  0xa0   : > { %v237_v6 = vmul.f32 %v235_v3, %v225_v4  ;;  %v238_v7 = vmul.f32 %v235_v3, %v226_v5 }
  0xa3   : > { %v247_v8 = vpop.permute.xlu0 %246 }
  0xa4   : > { %v249_v9 = vadd.f32 %v247_v8, %v237_v6  ;;  %v250_v10 = vadd.f32 %v247_v8, %v238_v7 }
  0xa6   : > { %v251_v11 = vmax.f32 %v249_v9, 0.0  ;;  %v252_v12 = vmax.f32 %v250_v10, 0.0 }
  0xa8   : > { %254 = vst.msk [vmem:[%s209_s9] sm:$0xff] %vm253_vm0, %v251_v11  ;;  %255 = vst.msk [vmem:[%s209_s9 + $0x8] sm:$0xff] %vm253_vm0, %v252_v12 }
  0xa9   : > { %480 = shalt.err (!%p477_p7)
}
  0xaa   : > { %s481_s27 = scalar_lea.hbm %s679_s23, 256  ;;  %s485_s5 = scalar_lea.hbm %s736_s3, 2048 }
  0xab   : > { %p482_p9 = scmp.ne.s32.totalorder %s679_s23, %s481_s27  ;;  %p486_p12 = scmp.lt.u32.totalorder %s679_s23, %s736_s3 }
  0xac   : > { %p487_p13 = scmp.lt.u32.totalorder %s485_s5, %s481_s27  ;;  %p489_p1 = scmp.lt.u32.totalorder %s481_s27, %s679_s23 }
  0xad   : > { %p483_p10 = pnand %p482_p9, %p638_p3 }
  0xae   : > { %p488_p0 = por %p487_p13, %p486_p12 }
  0xaf   : > { %p484_p11 = pneg %p483_p10 }
  0xb0   : > { %p490_p2 = por %p489_p1, %p488_p0 }
  0xb2   : > { %p491_p4 = pnand %p490_p2, %p484_p11 }
  0xb4   : > { %494 = shalt.err (!%p491_p4)
}
  0xb5   : > { %s565_s7 = smov 128   ;;  %s566_s9 = smov 8  }
  0xb6   : > { %392 = dma.vmem_to_hbm [thread:$0]  (%p638_p3), %s674_s4, 256, %s679_s23, %s681_s1, %s565_s7, %s565_s7, %s566_s9  }
  0xb7 PF: > { %p398_p5 = scmp.ge.s32.totalorder %s561_s19, 2  ;;  %s287_s10 = sand.u32 1, %s533_s12  }
  0xb8   : > { %s288_s15 = scalar_lea.sflag [#allocation3], %s287_s10 }
  0xb9   : > { %p395_p6 = pnand %p398_p5, %p647_p8 }
  0xbb   : > { %528 = dma.done.wait (!%p395_p6), %s288_s15, 256  }
  0xbc   : > { %530 = vsyncadd (!%p395_p6), %s288_s15, 4294967040  ;;  %s16_s19 = sadd.s32 1, %s561_s19   ;;  %s743_s25 = sld [smem:[#allocation5_spill]] }
  0xbd   : > { %p13_p7 = scmp.ge.s32.totalorder %s16_s19, 10   ;;  %s744_s12 = smov %s537_s13 }
  0xbe   : > { %s745_s13 = smov %s541_s14  ;;  %s746_s14 = smov %s656_s30 }
  0xbf   : > { %s747_s15 = smov %s553_s17  ;;  %s748_s16 = smov %s557_s18 }
  0xc0   : > { %s749_s17 = smov %s752_s22  ;;  %15 = sbr.rel (!%p13_p7) target bundleno = 7 (0x7), region = 73 }
  0xc2   : > { %s750_s18 = smov %s743_s25 }
  0xc7   :  { %293 = vsyncpa [#allocation3], 1 }
  0xc8   :  { %295 = vsyncpa [#allocation3 + $0x1], 1 }

// kernel: depthwise_conv_bn_relu.2
= control target key start
LH: loop header
LB: loop body
LE: loop exit
PB: predicated region body
PF: predicated region fallthrough
CT: control target
= control target key end

     0   :  { %11 = vsyncpa [#allocation4], 0  ;;  %s1171_s0 = inlined_call_operand.hbm [shape: f32[2,4,16,16], index: 0, kind: input, shape index: {}]   ;;  %s1172_s1 = inlined_call_operand.vmem [shape: f32[4,1,3,3], index: 1, kind: input, shape index: {}]   ;;  %s1173_s2 = inlined_call_operand.vmem [shape: f32[4,1,1,1], index: 2, kind: input, shape index: {}]   ;;  %s1174_s3 = inlined_call_operand.vmem [shape: f32[2,4,16,16], index: 3, kind: output, shape index: {0}]   ;;  %s1175_s4 = inlined_call_operand.vmem [shape: f32[4,1,1,1], index: 4, kind: output, shape index: {1}]   ;;  %s1176_s5 = inlined_call_operand.vmem [shape: f32[4,1,1,1], index: 5, kind: output, shape index: {2}]  }
   0x1   :  { %13 = vsyncpa [#allocation4 + $0x1], 0  ;;  %s954_s18 = smov 0   ;;  %s956_s19 = smov 0  }
   0x2   :  { %s958_s20 = smov 0   ;;  %s960_s21 = smov 0  }
   0x3   :  { %s962_s22 = smov 0   ;;  %s964_s23 = smov 0  }
   0x4   :  { %s966_s24 = smov 0   ;;  %s968_s25 = smov 0  }
   0x5 LB: > { %s701_s26 = sadd.s32 4294967295, %s913_s25   ;;  %s28_s27 = sadd.s32 1, %s905_s23  ;;  %s913_s25 = sphi %s968_s25, %s19_s25   ;;  %s909_s24 = sphi %s966_s24, %s1193_s24   ;;  %s905_s23 = sphi %s964_s23, %s1192_s23   ;;  %s901_s22 = sphi %s962_s22, %s1191_s22   ;;  %s897_s21 = sphi %s960_s21, %s1190_s21   ;;  %s893_s20 = sphi %s958_s20, %s1189_s20   ;;  %s889_s19 = sphi %s956_s19, %s1188_s19   ;;  %s885_s18 = sphi %s954_s18, %s1187_s18  }
   0x6   : > { %p29_p0 = scmp.ge.s32.totalorder %s28_s27, 2  ;;  %s31_s28 = sadd.s32 1, %s909_s24 }
   0x7   : > { %s40_s29 = sadd.s32 1, %s893_s20  ;;  %p47_p1 = scmp.ne.s32.totalorder %s893_s20, %s889_s19 }
   0x8   : > { %s1195_s27 = smov (%p29_p0, %s28_s27), 0  ;;  %s1197_s28 = smov (!%p29_p0, %s31_s28), %s909_s24 }
   0x9   : > { %1179 = sst [smem:[#allocation6_spill]] %s1195_s27  ;;  %s35_s30 = ssub.s32 %s905_s23, %s1195_s27 }
   0xa   : > { %p48_p2 = scmp.eq.s32.totalorder %s913_s25, 0  ;;  %p33_p3 = scmp.ge.s32.totalorder %s1197_s28, 4 }
   0xb   : > { %p53_p4 = scmp.ne.s32.totalorder %s889_s19, %s885_s18  ;;  %p54_p6 = scmp.eq.s32.totalorder %s701_s26, 0 }
   0xc   : > { %p1005_p5 = por %p48_p2, %p47_p1  ;;  %s1199_s28 = smov (%p33_p3, %s1197_s28), 0 }
   0xd   : > { %1181 = sst [smem:[#allocation7_spill]] %s1199_s28  ;;  %p1011_p7 = por %p54_p6, %p53_p4 }
   0xe   : > { %s36_s8 = ssub.s32 %s909_s24, %s1199_s28  ;;  %p743_p8 = scmp.lt.s32.totalorder %s913_s25, 8 }
   0xf   : > { %s37_s9 = sor.u32 %s36_s8, %s35_s30  ;;  %s209_s10 = sand.u32 1, %s893_s20  }
  0x10   : > { %p38_p9 = scmp.eq.s32.totalorder %s37_s9, 0  ;;  %s705_s11 = sshll.u32 %s209_s10, 4 }
  0x11   : > { %s706_s12 = sshll.u32 %s909_s24, 1  ;;  %s707_s14 = sshll.u32 %s905_s23, 3 }
  0x12   : > { %s1021_s13 = scalar_select %p38_p9, %s893_s20, %s40_s29  }
  0x13   : > { %s219_s15 = sadd.s32 %s707_s14, %s706_s12  ;;  %s213_s16 = scalar_lea.vmem [#allocation3], %s705_s11 }
  0x14   : > { %s222_s17 = sshll.u32 %s213_s16, 4  ;;  %s708_s18 = sshll.u32 %s219_s15, 7  ;;  %s1024_s17 = int_to_ptr.vmem [resolvable:$true] %s222_s17 }
  0x15   : > { %s1029_s28 = scalar_lea.hbm %s1171_s0, %s708_s18  ;;  %p1035_p10 = pnand %p743_p8, %p1005_p5 }
  0x16   : > { %s1040_s30 = scalar_lea.sflag [#allocation4], %s209_s10  ;;  %s817_s8 = scalar_lea.hbm %s1029_s28, 256 }
  0x17   : > { %p818_p12 = scmp.ne.s32.totalorder %s1029_s28, %s817_s8  ;;  %p819_p13 = pneg %p1035_p10 }
  0x18   : > { %s822_s9 = scalar_lea.hbm %s1171_s0, 2048  ;;  %p823_p2 = scmp.lt.u32.totalorder %s1029_s28, %s1171_s0 }
  0x19   : > { %p820_p0 = pnand %p819_p13, %p818_p12  ;;  %p824_p3 = scmp.lt.u32.totalorder %s822_s9, %s817_s8 }
  0x1a   : > { %p826_p5 = scmp.lt.u32.totalorder %s817_s8, %s1029_s28 }
  0x1b   : > { %p821_p1 = pneg %p820_p0  ;;  %p825_p4 = por %p824_p3, %p823_p2 }
  0x1d   : > { %p827_p6 = por %p826_p5, %p825_p4 }
  0x1f   : > { %p828_p8 = pnand %p827_p6, %p821_p1 }
  0x21   : > { %831 = shalt.err (!%p828_p8)
}
  0x22   : > { %s832_s10 = scalar_lea.vmem %s1024_s17, 256  ;;  %s915_s14 = smov [#allocation3]  }
  0x23   : > { %p833_p9 = scmp.ne.s32.totalorder %s1024_s17, %s832_s10  ;;  %s837_s15 = sshll.u32 %s915_s14, 4  ;;  %s838_s15 = int_to_ptr.vmem [resolvable:$false] %s837_s15 }
  0x24   : > { %s839_s16 = scalar_lea.vmem %s838_s15, 512  ;;  %p840_p11 = scmp.lt.s32.totalorder %s1024_s17, %s838_s15 }
  0x25   : > { %p835_p12 = pnand %p833_p9, %p819_p13  ;;  %p841_p2 = scmp.lt.s32.totalorder %s839_s16, %s832_s10 }
  0x27   : > { %p836_p0 = pneg %p835_p12  ;;  %p842_p3 = por %p841_p2, %p840_p11 }
  0x29   : > { %p843_p4 = pnand %p842_p3, %p836_p0 }
  0x2b   : > { %846 = shalt.err (!%p843_p4)
}
  0x2c   : > { %s916_s18 = smov 128   ;;  %s917_s26 = smov 8  }
  0x2d   : > { %742 = dma.hbm_to_vmem [thread:$0]  (!%p1035_p10), %s1029_s28, 256, %s1024_s17, %s1040_s30, %s916_s18, %s916_s18, %s917_s26  }
  0x2e   : > { %p243_p13 = scmp.lt.s32.totalorder %s913_s25, 9  ;;  %p1184_p1 = scmp.ge.s32.totalorder %s913_s25, 1 }
  0x30   : > { %p244_p5 = pnand %p1184_p1, %p243_p13 }
  0x31   : > { %s249_s8 = sand.u32 (!%p244_p5), 1, %s889_s19  }
  0x32   : > { %247 = sbr.rel (%p244_p5) target bundleno = 549 (0x225), region = 32  ;;  %s1072_s27 = sshll.u32 (!%p244_p5), %s249_s8, 4 }
  0x33   : > { %s250_s6 = scalar_lea.sflag (!%p244_p5), [#allocation4], %s249_s8  ;;  %s253_s9 = scalar_lea.vmem (!%p244_p5), [#allocation3], %s1072_s27 }
  0x39   : > { %880 = dma.done.wait (%p1011_p7), %s250_s6, 256  }
  0x3a   : > { %882 = vsyncadd (%p1011_p7), %s250_s6, 4294967040  ;;  %p297_p10 = scmp.lt.s32.totalorder %s901_s22, 3  ;;  %vm319_vm0 = vcmask 139264   ;;  %vm322_vm1 = vcmask 7168   ;;  %vm325_vm2 = vcmask 1024   ;;  %vm327_vm3 = vcmask 146568  }
  0x3b   : > { %vm330_vm4 = vcmask 140424   ;;  %v918_v0 = vmov 0.0   ;;  %s919_s16 = smov 127   ;;  %s920_s18 = smov 126   ;;  %v332_v4 = vld [vmem:[%s253_s9] sm:$0xff]  ;;  %v333_v5 = vld [vmem:[%s253_s9 + $0x8] sm:$0xff] }
  0x3c   : > { %s1201_s22 = smov (!%p297_p10, %s901_s22), 3  ;;  %321 = vst.msk [vmem:[#allocation2 + $0x11] sm:$0x1] %vm319_vm0, %v918_v0  ;;  %320 = vst.msk [vmem:[#allocation2] sm:$0x1] %vm319_vm0, %v918_v0  ;;  %s921_s26 = smov 1  }
  0x3d   : > { %s711_s28 = sshll.u32 %s1201_s22, 2  ;;  %s1088_s30 = scalar_lea.vmem %s1175_s4, %s1201_s22  ;;  %324 = vst.msk [vmem:[#allocation2 + $0x8] sm:$0xff] %vm322_vm1, %v918_v0  ;;  %323 = vst.msk [vmem:[#allocation2] sm:$0xff] %vm322_vm1, %v918_v0  ;;  %v922_v6 = vmov 0   ;;  %vm342_vm5 = vcmask 138248   ;;  %vm488_vm6 = vcmask 130048  }
  0x3e   : > { %s300_s10 = scalar_lea.vmem %s1172_s1, %s711_s28  ;;  %s1097_s15 = scalar_lea.vmem %s1176_s5, %s1201_s22  ;;  %326 = vst.msk [vmem:[#allocation2 + $0x10] sm:$0x3] %vm325_vm2, %v918_v0  ;;  %816 = vset.pattern.permute.xlu0 %v922_v6 }
  0x3f   : > { %v345_v1 = vld [vmem:[%s300_s10] sm:$0x7]  ;;  %329 = vst.msk [vmem:[#allocation2 + $0x8] sm:$0xff] %vm327_vm3, %v918_v0  ;;  %328 = vst.msk [vmem:[#allocation2] sm:$0xff] %vm327_vm3, %v918_v0  ;;  %s303_s7 = scalar_lea.vmem %s1173_s2, %s1201_s22  ;;  %p304_p7 = scmp.lt.s32.totalorder %s897_s21, 1 }
  0x40   : > { %354 = vrot.lane.b32.xlu0 %v345_v1, %s919_s16  ;;  %v370_v2 = vrot.slane %v345_v1, 1  ;;  %719 = vpush %v345_v1  ;;  %v392_v3 = vrot.slane %v345_v1, 2  ;;  %v715_v40 = vld [vmem:[%s303_s7] ss:$0 sm:$0xff]  ;;  %p716_p11 = scmp.ne.s32.totalorder %s897_s21, 0 }
  0x41   : > { %331 = vst.msk [vmem:[#allocation2 + $0x10] sm:$0x3] %vm330_vm4, %v918_v0  ;;  %vm495_vm7 = vcmask (!%p716_p11), 0  }
  0x42   : > { %376 = vrot.lane.b32.xlu1 %v370_v2, %s919_s16 }
  0x44   : > { %361 = vrot.lane.b32.xlu0 %v345_v1, %s920_s18 }
  0x46   : > { %383 = vrot.lane.b32.xlu1 %v370_v2, %s920_s18 }
  0x48   : > { %398 = vrot.lane.b32.xlu0 %v392_v3, %s919_s16 }
  0x4a   : > { %405 = vrot.lane.b32.xlu1 %v392_v3, %s920_s18 }
  0x4c   : > { %336 = vrot.lane.b32.xlu0 %v332_v4, %s921_s26 }
  0x4e   : > { %338 = vrot.lane.b32.xlu1 %v333_v5, %s921_s26 }
  0x71   : > { %s1109_s8 = spop %719 }
  0x72   : > { %v350_v46 = vstv %s1109_s8 }
  0xb2   : > { %v355_v7 = vpop.permute.xlu0 %354 }
  0xb3   : > { %721 = vpush %v355_v7 }
  0xb4   : > { %v377_v8 = vpop.permute.xlu1 %376 }
  0xb6   : > { %v362_v9 = vpop.permute.xlu0 %361 }
  0xb7   : > { %723 = vpush %v362_v9 }
  0xb8   : > { %725 = vpush %v370_v2  ;;  %v384_v10 = vpop.permute.xlu1 %383 }
  0xb9   : > { %727 = vpush %v377_v8 }
  0xba   : > { %729 = vpush %v384_v10  ;;  %v399_v11 = vpop.permute.xlu0 %398 }
  0xbb   : > { %731 = vpush %v392_v3 }
  0xbc   : > { %733 = vpush %v399_v11  ;;  %v406_v12 = vpop.permute.xlu1 %405 }
  0xbd   : > { %735 = vpush %v406_v12 }
  0xbe   : > { %v337_v13 = vpop.permute.xlu0 %336 }
  0xbf   : > { %343 = vst.msk [vmem:[#allocation2 + $0x1] sm:$0xff] %vm342_vm5, %v337_v13 }
  0xc0   : > { %v339_v14 = vpop.permute.xlu1 %338 }
  0xc1   : > { %344 = vst.msk [vmem:[#allocation2 + $0x9] sm:$0xff] %vm342_vm5, %v339_v14 }
  0xc6   : > { %v346_v15 = vld [vmem:[#allocation2] sm:$0xff] }
  0xc7   : > { %v368_v24 = vld [vmem:[#allocation2 + $0x1] sm:$0xff]  ;;  %v352_v49 = vmul.f32 %v350_v46, %v346_v15 }
  0xc8   : > { %v347_v16 = vld [vmem:[#allocation2 + $0x8] sm:$0xff] }
  0xc9   : > { %v369_v20 = vld [vmem:[#allocation2 + $0x9] sm:$0xff]  ;;  %v353_v50 = vmul.f32 %v350_v46, %v347_v16 }
  0xca   : > { %v391_v29 = vld [vmem:[#allocation2 + $0xa] sm:$0xff]  ;;  %v390_v31 = vld [vmem:[#allocation2 + $0x2] sm:$0xff] }
  0xe4   : > { %s722_s27 = spop %721 }
  0xe5   : > { %v357_v17 = vstv %s722_s27 }
  0xe6   : > { %v359_v18 = vmul.f32 %v357_v17, %v346_v15  ;;  %v360_v19 = vmul.f32 %v357_v17, %v347_v16 }
  0xe8   : > { %s724_s6 = spop %723  ;;  %416 = vrot.lane.b32.xlu1 %v360_v19, %s919_s16  ;;  %414 = vrot.lane.b32.xlu0 %v359_v18, %s919_s16 }
  0xe9   : > { %v364_v21 = vstv %s724_s6  ;;  %s726_s9 = spop %725 }
  0xea   : > { %v366_v22 = vmul.f32 %v364_v21, %v346_v15  ;;  %v367_v23 = vmul.f32 %v364_v21, %v347_v16  ;;  %v372_v25 = vstv %s726_s9  ;;  %s728_s28 = spop %727  ;;  %v923_v16 = vmov (!%p716_p11), 0.0  }
  0xeb   : > { %v374_v26 = vmul.f32 %v372_v25, %v368_v24  ;;  %v375_v27 = vmul.f32 %v372_v25, %v369_v20  ;;  %v379_v28 = vstv %s728_s28  ;;  %s730_s17 = spop %729  ;;  %496 = vst.msk [vmem:[%s1088_s30] sm:$0x1] (!%p716_p11), %vm495_vm7, %v923_v16  ;;  %497 = vst.msk [vmem:[%s1097_s15] sm:$0x1] (!%p716_p11), %vm495_vm7, %v923_v16 }
  0xec   : > { %v382_v30 = vmul.f32 %v379_v28, %v369_v20  ;;  %s732_s29 = spop %731  ;;  %426 = vrot.lane.b32.xlu1 %v367_v23, %s920_s18  ;;  %424 = vrot.lane.b32.xlu0 %v366_v22, %s920_s18  ;;  %v381_v33 = vmul.f32 %v379_v28, %v368_v24  ;;  %v386_v36 = vstv %s730_s17 }
  0xed   : > { %v394_v32 = vstv %s732_s29  ;;  %s734_s11 = spop %733  ;;  %v388_v37 = vmul.f32 %v386_v36, %v368_v24  ;;  %v389_v38 = vmul.f32 %v386_v36, %v369_v20 }
  0xee   : > { %v396_v34 = vmul.f32 %v394_v32, %v390_v31  ;;  %v397_v35 = vmul.f32 %v394_v32, %v391_v29  ;;  %v401_v39 = vstv %s734_s11  ;;  %s736_s14 = spop %735 }
  0xef   : > { %v403_v41 = vmul.f32 %v401_v39, %v390_v31  ;;  %v408_v42 = vstv %s736_s14  ;;  %v404_v43 = vmul.f32 %v401_v39, %v391_v29 }
  0xf0   : > { %438 = vrot.lane.b32.xlu1 %v382_v30, %s919_s16  ;;  %436 = vrot.lane.b32.xlu0 %v381_v33, %s919_s16  ;;  %v410_v44 = vmul.f32 %v408_v42, %v390_v31  ;;  %v411_v45 = vmul.f32 %v408_v42, %v391_v29 }
  0xf4   : > { %448 = vrot.lane.b32.xlu1 %v389_v38, %s920_s18  ;;  %446 = vrot.lane.b32.xlu0 %v388_v37, %s920_s18 }
  0xf8   : > { %458 = vrot.lane.b32.xlu1 %v403_v41, %s919_s16  ;;  %483 = vperm.xlu0 %816, %v715_v40  }
  0xfc   : > { %460 = vrot.lane.b32.xlu1 %v404_v43, %s919_s16  ;;  %468 = vrot.lane.b32.xlu0 %v410_v44, %s920_s18  ;;  %s305_s16 = scalar_select %p304_p7, %s897_s21, 1 }
  0xfe   : > { %s713_s26 = sshll.u32 %s305_s16, 3 }
 0x100   : > { %470 = vrot.lane.b32.xlu1 %v411_v45, %s920_s18  ;;  %s712_s18 = sshll.u32 %s1201_s22, 1 }
 0x101   : > { %s310_s8 = sadd.s32 %s713_s26, %s712_s18 }
 0x102   : > { %s714_s27 = sshll.u32 %s310_s8, 3 }
 0x103   : > { %s312_s28 = scalar_lea.vmem %s1174_s3, %s714_s27 }
 0x15a   : > { %v417_v47 = vpop.permute.xlu1 %416  ;;  %v415_v48 = vpop.permute.xlu0 %414 }
 0x15b   : > { %v421_v51 = vadd.f32 %v417_v47, %v353_v50  ;;  %v420_v52 = vadd.f32 %v415_v48, %v352_v49 }
 0x15e   : > { %v427_v53 = vpop.permute.xlu1 %426  ;;  %v425_v54 = vpop.permute.xlu0 %424 }
 0x15f   : > { %v431_v55 = vadd.f32 %v427_v53, %v421_v51  ;;  %v430_v56 = vadd.f32 %v425_v54, %v420_v52 }
 0x161   : > { %v433_v57 = vadd.f32 %v431_v55, %v375_v27  ;;  %v432_v58 = vadd.f32 %v430_v56, %v374_v26 }
 0x162   : > { %v439_v59 = vpop.permute.xlu1 %438  ;;  %v437_v60 = vpop.permute.xlu0 %436 }
 0x163   : > { %v443_v61 = vadd.f32 %v439_v59, %v433_v57  ;;  %v442_v62 = vadd.f32 %v437_v60, %v432_v58 }
 0x166   : > { %v449_v63 = vpop.permute.xlu1 %448  ;;  %v447_v0 = vpop.permute.xlu0 %446 }
 0x167   : > { %v453_v1 = vadd.f32 %v449_v63, %v443_v61  ;;  %v452_v2 = vadd.f32 %v447_v0, %v442_v62 }
 0x169   : > { %v454_v3 = vadd.f32 %v452_v2, %v396_v34  ;;  %v455_v4 = vadd.f32 %v453_v1, %v397_v35 }
 0x16a   : > { %v459_v5 = vpop.permute.xlu1 %458 }
 0x16b   : > { %v464_v12 = vadd.f32 %v459_v5, %v454_v3 }
 0x16e   : > { %v461_v6 = vpop.permute.xlu1 %460 }
 0x16f   : > { %v465_v8 = vadd.f32 %v461_v6, %v455_v4 }
 0x172   : > { %v471_v7 = vpop.permute.xlu1 %470 }
 0x173   : > { %v475_v9 = vadd.f32 %v471_v7, %v465_v8 }
 0x177   : > { %v484_v10 = vpop.permute.xlu0 %483 }
 0x178   : > { %v487_v11 = vadd.f32 %v484_v10, %v475_v9 }
 0x17a   : > { %490 = vst.msk [vmem:[%s312_s28 + $0x8] sm:$0xff] %vm488_vm6, %v487_v11  ;;  %494 = sbr.rel (%p716_p11) target bundleno = 385 (0x181), region = 40 }
 0x17b   : > { %v469_v13 = vpop.permute.xlu0 %468 }
 0x17c   : > { %v474_v14 = vadd.f32 %v469_v13, %v464_v12 }
 0x17e   : > { %v486_v15 = vadd.f32 %v484_v10, %v474_v14 }
 0x180   : > { %489 = vst.msk [vmem:[%s312_s28] sm:$0xff] %vm488_vm6, %v486_v15 }
 0x181 PF: > { %v499_v17 = vsel %vm488_vm6, %v486_v15, 0.0  ;;  %v500_v18 = vsel %vm488_vm6, %v487_v11, 0.0  ;;  %v514_v19 = vmul.f32 %v486_v15, %v486_v15  ;;  %v515_v20 = vmul.f32 %v487_v11, %v487_v11  ;;  %v498_v35 = vld [vmem:[%s1088_s30] sm:$0x1] }
 0x182   : > { %v501_v21 = vadd.f32 %v500_v18, %v499_v17  ;;  %vm511_vm8 = vcmask 0   ;;  %v513_v40 = vld [vmem:[%s1097_s15] sm:$0x1] }
 0x183   : > { %v516_v22 = vsel %vm488_vm6, %v514_v19, 0.0  ;;  %v517_v23 = vsel %vm488_vm6, %v515_v20, 0.0 }
 0x184   : > { %502 = vadd.xlane.f32.xlu0 %v501_v21  ;;  %v518_v24 = vadd.f32 %v517_v23, %v516_v22 }
 0x188   : > { %519 = vadd.xlane.f32.xlu0 %v518_v24 }
 0x211   : > { %v503_v25 = vpop.xlane.xlu0 %502 }
 0x212   : > { %v504_v26 = vrot.slane %v503_v25, 4 }
 0x214   : > { %v505_v27 = vadd.f32 %v504_v26, %v503_v25 }
 0x215   : > { %v520_v28 = vpop.xlane.xlu0 %519 }
 0x216   : > { %v506_v29 = vrot.slane %v505_v27, 2  ;;  %v521_v30 = vrot.slane %v520_v28, 4 }
 0x218   : > { %v507_v31 = vadd.f32 %v506_v29, %v505_v27  ;;  %v522_v32 = vadd.f32 %v521_v30, %v520_v28 }
 0x21a   : > { %v508_v33 = vrot.slane %v507_v31, 1  ;;  %v523_v34 = vrot.slane %v522_v32, 2 }
 0x21c   : > { %v509_v36 = vadd.f32 %v508_v33, %v507_v31  ;;  %v524_v37 = vadd.f32 %v523_v34, %v522_v32 }
 0x21e   : > { %v510_v38 = vadd.f32 %v509_v36, %v498_v35  ;;  %v525_v39 = vrot.slane %v524_v37, 1 }
 0x220   : > { %512 = vst.msk [vmem:[%s1088_s30] sm:$0x1] %vm511_vm8, %v510_v38  ;;  %v526_v41 = vadd.f32 %v525_v39, %v524_v37 }
 0x222   : > { %v527_v42 = vadd.f32 %v526_v41, %v513_v40 }
 0x224   : > { %528 = vst.msk [vmem:[%s1097_s15] sm:$0x1] %vm511_vm8, %v527_v42 }
 0x225 PF: > { %s19_s25 = sadd.s32 1, %s913_s25   ;;  %s1185_s17 = sld [smem:[#allocation6_spill]] }
 0x226   : > { %p16_p6 = scmp.ge.s32.totalorder %s19_s25, 10   ;;  %s1186_s29 = sld [smem:[#allocation7_spill]] }
 0x227   : > { %s1187_s18 = smov %s889_s19  ;;  %s1188_s19 = smov %s893_s20 }
 0x228   : > { %s1189_s20 = smov %s1021_s13  ;;  %s1190_s21 = smov %s905_s23 }
 0x229   : > { %s1191_s22 = smov %s909_s24  ;;  %18 = sbr.rel (!%p16_p6) target bundleno = 5 (0x5), region = 106 }
 0x22b   : > { %s1192_s23 = smov %s1185_s17 }
 0x22c   : > { %s1193_s24 = smov %s1186_s29 }
 0x230   :  { %582 = vsyncpa [#allocation4], 1 }
 0x231   :  { %584 = vsyncpa [#allocation4 + $0x1], 1 }

</bundles_post_ra>
